<compile_context>
chip_gen: v7x
topology: tpu7x:2x2x1
jax: 0.10.0
libtpu: 0.0.40
codegen_flags: <defaults>
</compile_context>

<pallas_src>
import functools
import math

import jax
import jax.numpy as jnp
from jax.experimental import pallas as pl
from jax.experimental.pallas import tpu as pltpu

# ---- module configuration (kwargs of ProgramRLVAE.__init__) -----------------
CONTROLLER_INPUT_COEF = 0.1      # kwargs['net']['controller']['input_coef']
TANH_AFTER_SAMPLE = True         # kwargs['net']['tanh_after_sample']
USE_DECODER_DIST = False         # kwargs['net']['controller']['use_decoder_dist']
USE_PREVIOUS_PROGRAMS = True     # kwargs['net']['controller']['use_previous_programs']
PROGRAM_REDUCTION = "mean"       # kwargs['net']['controller']['program_reduction']
NUM_DEMO_PER_PROGRAM = 4         # kwargs['rl']['envs']['executable']['num_demo_per_program']
MAX_DEMO_LENGTH = 8              # kwargs['rl']['envs']['executable']['max_demo_length']

LOG_2PI = math.log(2.0 * math.pi)
LANES = 128


def _rlvae_act_kernel(act_ref, w_ref, b_ref, out_ref, *, H, L):
    # ---- single full-width loads of the three lane-dense slabs --------------
    act = act_ref[...]                       # (B, LANE_PAD(H+L+1)) f32
    W = w_ref[...]                           # (H, LANE_PAD(2H+2L)) f32
    bias = b_ref[...]                        # (1, LANE_PAD(2H+2L)) f32
    B = act.shape[0]

    rnn = act[:, 0:H]                        # (B, H)
    eps = act[:, H:H + L]                    # (B, L) standard normal noise
    mask = act[:, H + L:H + L + 1]           # (B, 1) in {0., 1.}

    w1 = W[:, 0:H]
    w2 = W[:, H:2 * H]
    wms = W[:, 2 * H:2 * H + 2 * L]          # fused [W_mu | W_log_sigma]
    b1 = bias[:, 0:H]
    b2 = bias[:, H:2 * H]
    bms = bias[:, 2 * H:2 * H + 2 * L]

    # --- meta_inputs: coef constant, optionally replaced by mean(rnn_hxs) ----
    if USE_PREVIOUS_PROGRAMS:
        if PROGRAM_REDUCTION == "identity":
            prev = rnn                                            # (B, H)
        else:  # 'mean': rnn_hxs.mean(0, True).expand(B, -1)
            prev = jnp.mean(rnn, axis=0, keepdims=True)           # (1, H)
        # torch.where(masks.repeat(1,H).bool(), prev, coef); broadcasting does
        # the expansion — no jnp.full / broadcast_to materialisation.
        meta_in = jnp.where(mask > 0.5, prev, CONTROLLER_INPUT_COEF)
    else:
        meta_in = jnp.full(rnn.shape, CONTROLLER_INPUT_COEF, dtype=jnp.float32)

    # --- MetaController (add_noise=False): Linear -> Tanh -> Linear -> Tanh --
    h1 = jnp.tanh(jnp.dot(meta_in, w1, preferred_element_type=jnp.float32) + b1)
    h_meta = jnp.tanh(jnp.dot(h1, w2, preferred_element_type=jnp.float32) + b2)

    # --- ProgramVAE.vae._sample_latent: fused [mu | log_sigma] head ----------
    fused = jnp.dot(h_meta, wms, preferred_element_type=jnp.float32) + bms  # (B, 2L)
    mu = fused[:, :L]
    log_sigma = fused[:, L:]
    sigma = jnp.exp(log_sigma)
    pre_tanh = mu + sigma * eps

    if TANH_AFTER_SAMPLE or not USE_DECODER_DIST:
        z = jnp.tanh(pre_tanh)
    else:
        z = pre_tanh

    # --- latent_log_probs = TanhNormal.log_probs(z, pre_tanh) ----------------
    # log N(pre_tanh; mu, sigma) with (pre_tanh - mu)/sigma == eps and
    # log(sigma) == log_sigma reused exactly; tanh correction matches torch
    # (log(1 - tanh(x)^2 + 1e-6)).
    normal_lp = -0.5 * (eps * eps) - log_sigma - 0.5 * LOG_2PI
    tanh_corr = jnp.log(1.0 - jnp.square(z) + 1e-6)
    lp = jnp.sum(normal_lp - tanh_corr, axis=-1, keepdims=True)          # (B, 1)

    # --- latent_dist_entropy = Normal.entropy().mean() -----------------------
    ent = 0.5 + 0.5 * LOG_2PI + jnp.mean(log_sigma)                      # scalar

    # --- direct lane-slice stores into the (B, 4L) output tile ---------------
    # (no in-register concatenation, no zero filler; unused lanes never read)
    out_ref[:, 0:L] = z
    out_ref[:, L:2 * L] = mu
    out_ref[:, 2 * L:3 * L] = sigma
    out_ref[:, 3 * L:3 * L + 1] = lp
    out_ref[:, 3 * L + 1:3 * L + 2] = jnp.broadcast_to(ent, (B, 1))


def pack_params(params, hidden, latent):
    """One-time packing of all weights/biases into lane-dense slabs.

    weight slab (H, 2H+2L -> padded to 128-lane multiple) = [w1 | w2 | w_musig]
    bias   slab (1, 2H+2L -> padded)                      = [b1 | b2 | b_musig]
    """
    w_slab = jnp.concatenate([params["w1"], params["w2"], params["w_musig"]], axis=1)
    b_slab = jnp.concatenate([params["b1"], params["b2"], params["b_musig"]], axis=1)
    width = 2 * hidden + 2 * latent
    pad = (-width) % LANES
    if pad:
        w_slab = jnp.pad(w_slab, ((0, 0), (0, pad)))
        b_slab = jnp.pad(b_slab, ((0, 0), (0, pad)))
    return {"w_slab": w_slab, "b_slab": b_slab}


def program_rlvae_act(rnn_hxs, masks, eps, packed):
    """Pallas implementation of ProgramRLVAE.act() latent pipeline.

    Returns a dict mirroring the module outputs computable from the provided
    source; decoder / condition-policy outputs are TODO, agent_* placeholders
    are zeros exactly as in forward().
    """
    B, H = rnn_hxs.shape
    L = eps.shape[1]
    assert L >= 2

    # --- activation slab (B, H+L+1 -> padded to 128-lane multiple) -----------
    act_width = H + L + 1
    act_pad = (-act_width) % LANES
    parts = [rnn_hxs, eps, masks.astype(jnp.float32)]
    if act_pad:
        parts.append(jnp.zeros((B, act_pad), jnp.float32))
    act_slab = jnp.concatenate(parts, axis=-1)

    vmem = pl.BlockSpec(memory_space=pltpu.MemorySpace.VMEM)
    in_arrays = (act_slab, packed["w_slab"], packed["b_slab"])

    # Advisory cost estimate: helps XLA overlap this launch-bound custom call.
    flops = 2 * B * H * H + 2 * B * H * H + 2 * B * H * (2 * L) + 12 * B * L
    transcendentals = 2 * B * H + 3 * B * L
    bytes_accessed = 4 * (act_slab.size + packed["w_slab"].size
                          + packed["b_slab"].size + B * 4 * L)

    slab = pl.pallas_call(
        functools.partial(_rlvae_act_kernel, H=H, L=L),
        out_shape=jax.ShapeDtypeStruct((B, 4 * L), jnp.float32),
        in_specs=[vmem] * len(in_arrays),
        out_specs=vmem,
        cost_estimate=pl.CostEstimate(flops=flops,
                                      transcendentals=transcendentals,
                                      bytes_accessed=bytes_accessed),
    )(*in_arrays)

    z = slab[:, :L]
    # z_mean / z_sigma are adjacent in the slab -> a reshape, no concatenate.
    distribution_params = slab[:, L:3 * L].reshape(B, 2, L)
    latent_log_probs = slab[:, 3 * L:3 * L + 1]
    latent_dist_entropy = slab[0, 3 * L + 1]

    # use_condition_policy_in_rl == False branch: zero placeholders (glue).
    agent_value = jnp.zeros((B, NUM_DEMO_PER_PROGRAM, 1), dtype=jnp.int32)
    agent_actions = jnp.zeros((B, NUM_DEMO_PER_PROGRAM, MAX_DEMO_LENGTH - 1), dtype=jnp.int32)
    agent_action_log_probs = jnp.zeros((B, NUM_DEMO_PER_PROGRAM, 1), dtype=jnp.float32)
    agent_action_masks = jnp.zeros((B, NUM_DEMO_PER_PROGRAM, MAX_DEMO_LENGTH - 1), dtype=jnp.bool_)
    agent_action_dist_entropy = jnp.zeros((1,), dtype=jnp.float32)

    # TODO(synk): value / pred_programs / pred_program_masks / eop_pred_programs
    # come from ProgramVAE.vae.decoder (autoregressive LSTM), not in provided src.
    return {
        "z": z,
        "distribution_params": distribution_params,
        "latent_log_probs": latent_log_probs,
        "latent_dist_entropy": latent_dist_entropy,
        "agent_value": agent_value,
        "agent_actions": agent_actions,
        "agent_action_log_probs": agent_action_log_probs,
        "agent_action_masks": agent_action_masks,
        "agent_action_dist_entropy": agent_action_dist_entropy,
    }


def init_params(key, hidden, latent):
    """Deterministic synthetic parameters (orthogonal * sqrt(2), zero bias).

    The latent head weights are pre-fused here: w_musig = [W_mu | W_ls]
    (hidden, 2*latent), b_musig = [b_mu | b_ls] (1, 2*latent).
    """
    k1, k2, k3, k4 = jax.random.split(key, 4)
    gain = math.sqrt(2.0)
    w1 = gain * jax.random.orthogonal(k1, hidden).astype(jnp.float32)
    w2 = gain * jax.random.orthogonal(k2, hidden).astype(jnp.float32)
    w_mu = 0.1 * jax.random.normal(k3, (hidden, latent), jnp.float32)
    w_ls = 0.1 * jax.random.normal(k4, (hidden, latent), jnp.float32)
    return {
        "w1": w1, "b1": jnp.zeros((1, hidden), jnp.float32),
        "w2": w2, "b2": jnp.zeros((1, hidden), jnp.float32),
        "w_musig": jnp.concatenate([w_mu, w_ls], axis=1),
        "b_musig": jnp.zeros((1, 2 * latent), jnp.float32),
    }


def _reference_act(rnn_hxs, masks, eps, params):
    """Pure-JAX reference of the same math (for a correctness check)."""
    L = eps.shape[1]
    prev = jnp.mean(rnn_hxs, axis=0, keepdims=True)
    meta_in = jnp.where(masks > 0.5, prev, CONTROLLER_INPUT_COEF)
    h1 = jnp.tanh(meta_in @ params["w1"] + params["b1"])
    h_meta = jnp.tanh(h1 @ params["w2"] + params["b2"])
    fused = h_meta @ params["w_musig"] + params["b_musig"]
    mu, log_sigma = fused[:, :L], fused[:, L:]
    sigma = jnp.exp(log_sigma)
    pre_tanh = mu + sigma * eps
    z = jnp.tanh(pre_tanh)
    normal_lp = (-0.5 * jnp.square((pre_tanh - mu) / sigma)
                 - jnp.log(sigma) - 0.5 * LOG_2PI)
    lp = jnp.sum(normal_lp - jnp.log(1.0 - jnp.square(z) + 1e-6),
                 axis=-1, keepdims=True)
    ent = jnp.mean(0.5 + 0.5 * LOG_2PI + jnp.log(sigma))
    return z, mu, sigma, lp, ent


if __name__ == "__main__":
    B, H, L = 8, 32, 32          # batch, num_lstm_cell_units, latent_dim

    key = jax.random.PRNGKey(0)
    k_rnn, k_mask, k_eps, k_par = jax.random.split(key, 4)

    rnn_hxs = jax.random.normal(k_rnn, (B, H), jnp.float32)
    masks = (jax.random.uniform(k_mask, (B, 1)) > 0.25).astype(jnp.float32)
    eps = jax.random.normal(k_eps, (B, L), jnp.float32)   # reparam noise
    params = init_params(k_par, H, L)
    packed = pack_params(params, H, L)                    # one-time weight slabs

    out = program_rlvae_act(rnn_hxs, masks, eps, packed)
    out = jax.block_until_ready(out)

    assert out["z"].shape == (B, L)
    assert out["distribution_params"].shape == (B, 2, L)
    assert out["latent_log_probs"].shape == (B, 1)
    assert bool(jnp.all(jnp.isfinite(out["z"])))
    assert bool(jnp.all(jnp.isfinite(out["latent_log_probs"])))

    # Numerical check against a pure-JAX reference (loose tol: MXU f32 passes).
    z_r, mu_r, sig_r, lp_r, ent_r = _reference_act(rnn_hxs, masks, eps, params)
    assert bool(jnp.allclose(out["z"], z_r, atol=2e-2, rtol=2e-2))
    assert bool(jnp.allclose(out["distribution_params"][:, 0, :], mu_r, atol=2e-2, rtol=2e-2))
    assert bool(jnp.allclose(out["distribution_params"][:, 1, :], sig_r, atol=2e-2, rtol=2e-2))
    assert bool(jnp.allclose(out["latent_log_probs"], lp_r, atol=2e-2, rtol=2e-2))
    assert bool(jnp.allclose(out["latent_dist_entropy"], ent_r, atol=2e-2, rtol=2e-2))

    print("KERNEL_OK")
</pallas_src>

<mosaic_0001>
module attributes {stable_mosaic.version = 11 : i64} {
  func.func @_rlvae_act_kernel(%arg0: memref<8x128xf32, #tpu.memory_space<vmem>>, %arg1: memref<32x128xf32, #tpu.memory_space<vmem>>, %arg2: memref<1x128xf32, #tpu.memory_space<vmem>>, %arg3: memref<8x128xf32, #tpu.memory_space<vmem>>) attributes {dimension_semantics = [], scalar_prefetch = 0 : i64, scratch_operands = 0 : i64, tpu.core_type = #tpu.core_type<tc>} {
    %c0 = arith.constant 0 : index
    %c0_0 = arith.constant 0 : index
    %0 = vector.load %arg0[%c0, %c0_0] : memref<8x128xf32, #tpu.memory_space<vmem>>, vector<8x128xf32>
    %c0_1 = arith.constant 0 : index
    %c0_2 = arith.constant 0 : index
    %1 = vector.load %arg1[%c0_1, %c0_2] : memref<32x128xf32, #tpu.memory_space<vmem>>, vector<32x128xf32>
    %c0_3 = arith.constant 0 : index
    %c0_4 = arith.constant 0 : index
    %2 = vector.load %arg2[%c0_3, %c0_4] : memref<1x128xf32, #tpu.memory_space<vmem>>, vector<1x128xf32>
    %3 = vector.extract_strided_slice %0 {offsets = [0, 0], sizes = [8, 32], strides = [1, 1]} : vector<8x128xf32> to vector<8x32xf32>
    %4 = vector.extract_strided_slice %0 {offsets = [0, 32], sizes = [8, 32], strides = [1, 1]} : vector<8x128xf32> to vector<8x32xf32>
    %5 = vector.extract_strided_slice %0 {offsets = [0, 64], sizes = [8, 1], strides = [1, 1]} : vector<8x128xf32> to vector<8x1xf32>
    %6 = vector.extract_strided_slice %1 {offsets = [0, 0], sizes = [32, 32], strides = [1, 1]} : vector<32x128xf32> to vector<32x32xf32>
    %7 = vector.extract_strided_slice %1 {offsets = [0, 32], sizes = [32, 32], strides = [1, 1]} : vector<32x128xf32> to vector<32x32xf32>
    %8 = vector.extract_strided_slice %1 {offsets = [0, 64], sizes = [32, 64], strides = [1, 1]} : vector<32x128xf32> to vector<32x64xf32>
    %9 = vector.extract_strided_slice %2 {offsets = [0, 0], sizes = [1, 32], strides = [1, 1]} : vector<1x128xf32> to vector<1x32xf32>
    %10 = vector.extract_strided_slice %2 {offsets = [0, 32], sizes = [1, 32], strides = [1, 1]} : vector<1x128xf32> to vector<1x32xf32>
    %11 = vector.extract_strided_slice %2 {offsets = [0, 64], sizes = [1, 64], strides = [1, 1]} : vector<1x128xf32> to vector<1x64xf32>
    %cst = arith.constant dense<0.000000e+00> : vector<32xf32>
    %12 = vector.multi_reduction <add>, %3, %cst [0] : vector<8x32xf32> to vector<32xf32>
    %13 = vector.shape_cast %12 : vector<32xf32> to vector<1x32xf32>
    %cst_5 = arith.constant 8.000000e+00 : f32
    %14 = vector.broadcast %cst_5 : f32 to vector<1x32xf32>
    %15 = arith.divf %13, %14 : vector<1x32xf32>
    %cst_6 = arith.constant 5.000000e-01 : f32
    %16 = vector.broadcast %cst_6 : f32 to vector<8x1xf32>
    %17 = arith.cmpf ogt, %5, %16 : vector<8x1xf32>
    %cst_7 = arith.constant 1.000000e-01 : f32
    %18 = vector.shape_cast %17 : vector<8x1xi1> to vector<8x1xi1>
    %19 = vector.broadcast %18 : vector<8x1xi1> to vector<8x32xi1>
    %20 = vector.shape_cast %15 : vector<1x32xf32> to vector<1x32xf32>
    %21 = vector.broadcast %20 : vector<1x32xf32> to vector<8x32xf32>
    %22 = vector.broadcast %cst_7 : f32 to vector<8x32xf32>
    %23 = arith.select %19, %21, %22 : vector<8x32xi1>, vector<8x32xf32>
    %cst_8 = arith.constant dense<0.000000e+00> : vector<8x32xf32>
    %24 = tpu.matmul %23, %6, %cst_8 {dimension_numbers = #tpu.dot_dimension_numbers<[1], [0], [0], [1], [0, 0, 1, 1], [], []>} : vector<8x32xf32>, vector<32x32xf32>, vector<8x32xf32> -> vector<8x32xf32>
    %25 = vector.broadcast %9 : vector<1x32xf32> to vector<8x32xf32>
    %26 = arith.addf %24, %25 : vector<8x32xf32>
    %27 = math.tanh %26 : vector<8x32xf32>
    %cst_9 = arith.constant dense<0.000000e+00> : vector<8x32xf32>
    %28 = tpu.matmul %27, %7, %cst_9 {dimension_numbers = #tpu.dot_dimension_numbers<[1], [0], [0], [1], [0, 0, 1, 1], [], []>} : vector<8x32xf32>, vector<32x32xf32>, vector<8x32xf32> -> vector<8x32xf32>
    %29 = vector.broadcast %10 : vector<1x32xf32> to vector<8x32xf32>
    %30 = arith.addf %28, %29 : vector<8x32xf32>
    %31 = math.tanh %30 : vector<8x32xf32>
    %cst_10 = arith.constant dense<0.000000e+00> : vector<8x64xf32>
    %32 = tpu.matmul %31, %8, %cst_10 {dimension_numbers = #tpu.dot_dimension_numbers<[1], [0], [0], [1], [0, 0, 1, 1], [], []>} : vector<8x32xf32>, vector<32x64xf32>, vector<8x64xf32> -> vector<8x64xf32>
    %33 = vector.broadcast %11 : vector<1x64xf32> to vector<8x64xf32>
    %34 = arith.addf %32, %33 : vector<8x64xf32>
    %35 = vector.extract_strided_slice %34 {offsets = [0, 0], sizes = [8, 32], strides = [1, 1]} : vector<8x64xf32> to vector<8x32xf32>
    %36 = vector.extract_strided_slice %34 {offsets = [0, 32], sizes = [8, 32], strides = [1, 1]} : vector<8x64xf32> to vector<8x32xf32>
    %37 = math.exp %36 : vector<8x32xf32>
    %38 = arith.mulf %37, %4 : vector<8x32xf32>
    %39 = arith.addf %35, %38 : vector<8x32xf32>
    %40 = math.tanh %39 : vector<8x32xf32>
    %41 = arith.mulf %4, %4 : vector<8x32xf32>
    %cst_11 = arith.constant -5.000000e-01 : f32
    %42 = vector.broadcast %cst_11 : f32 to vector<8x32xf32>
    %43 = arith.mulf %42, %41 : vector<8x32xf32>
    %44 = arith.subf %43, %36 : vector<8x32xf32>
    %cst_12 = arith.constant 0.918938517 : f32
    %45 = vector.broadcast %cst_12 : f32 to vector<8x32xf32>
    %46 = arith.subf %44, %45 : vector<8x32xf32>
    %47 = arith.mulf %40, %40 : vector<8x32xf32>
    %cst_13 = arith.constant 1.000000e+00 : f32
    %48 = vector.broadcast %cst_13 : f32 to vector<8x32xf32>
    %49 = arith.subf %48, %47 : vector<8x32xf32>
    %cst_14 = arith.constant 9.99999997E-7 : f32
    %50 = vector.broadcast %cst_14 : f32 to vector<8x32xf32>
    %51 = arith.addf %49, %50 : vector<8x32xf32>
    %52 = math.log %51 : vector<8x32xf32>
    %53 = arith.subf %46, %52 : vector<8x32xf32>
    %cst_15 = arith.constant dense<0.000000e+00> : vector<8xf32>
    %54 = vector.multi_reduction <add>, %53, %cst_15 [1] : vector<8x32xf32> to vector<8xf32>
    %55 = vector.shape_cast %54 : vector<8xf32> to vector<8x1xf32>
    %56 = vector.shape_cast %36 : vector<8x32xf32> to vector<1x8x32xf32>
    %cst_16 = arith.constant dense<0.000000e+00> : vector<1xf32>
    %57 = vector.multi_reduction <add>, %56, %cst_16 [1, 2] : vector<1x8x32xf32> to vector<1xf32>
    %58 = vector.shape_cast %57 : vector<1xf32> to vector<1x1x1xf32>
    %59 = vector.extract %58[0, 0, 0] : f32 from vector<1x1x1xf32>
    %cst_17 = arith.constant 2.560000e+02 : f32
    %60 = arith.divf %59, %cst_17 : f32
    %cst_18 = arith.constant 1.41893852 : f32
    %61 = arith.addf %cst_18, %60 : f32
    %c0_19 = arith.constant 0 : index
    %c0_20 = arith.constant 0 : index
    %62 = vector.load %arg3[%c0_19, %c0_20] : memref<8x128xf32, #tpu.memory_space<vmem>>, vector<8x32xf32>
    tpu.vector_store %arg3[%c0_19, %c0_20], %40 {strides = array<i32>} : memref<8x128xf32, #tpu.memory_space<vmem>>, vector<8x32xf32>,
    %c0_21 = arith.constant 0 : index
    %c32 = arith.constant 32 : index
    %63 = vector.load %arg3[%c0_21, %c32] : memref<8x128xf32, #tpu.memory_space<vmem>>, vector<8x32xf32>
    tpu.vector_store %arg3[%c0_21, %c32], %35 {strides = array<i32>} : memref<8x128xf32, #tpu.memory_space<vmem>>, vector<8x32xf32>,
    %c0_22 = arith.constant 0 : index
    %c64 = arith.constant 64 : index
    %64 = vector.load %arg3[%c0_22, %c64] : memref<8x128xf32, #tpu.memory_space<vmem>>, vector<8x32xf32>
    tpu.vector_store %arg3[%c0_22, %c64], %37 {strides = array<i32>} : memref<8x128xf32, #tpu.memory_space<vmem>>, vector<8x32xf32>,
    %c0_23 = arith.constant 0 : index
    %c96 = arith.constant 96 : index
    %65 = vector.load %arg3[%c0_23, %c96] : memref<8x128xf32, #tpu.memory_space<vmem>>, vector<8x1xf32>
    tpu.vector_store %arg3[%c0_23, %c96], %55 {strides = array<i32>} : memref<8x128xf32, #tpu.memory_space<vmem>>, vector<8x1xf32>,
    %66 = vector.broadcast %61 : f32 to vector<8x1xf32>
    %c0_24 = arith.constant 0 : index
    %c97 = arith.constant 97 : index
    %67 = vector.load %arg3[%c0_24, %c97] : memref<8x128xf32, #tpu.memory_space<vmem>>, vector<8x1xf32>
    tpu.vector_store %arg3[%c0_24, %c97], %66 {strides = array<i32>} : memref<8x128xf32, #tpu.memory_space<vmem>>, vector<8x1xf32>,
    return
  }
}

</mosaic_0001>

<bundles_post_ra>
// kernel: tpu_custom_call.1
= control target key start
LH: loop header
LB: loop body
LE: loop exit
PB: predicated region body
PF: predicated region fallthrough
CT: control target
= control target key end

     0   :  { %8 = vsyncpa [#allocation3], 0  ;;  %s706_s0 = inlined_call_operand.hbm [shape: f32[8,128], index: 0, kind: input, shape index: {}]   ;;  %s707_s1 = inlined_call_operand.hbm [shape: f32[32,128], index: 1, kind: input, shape index: {}]   ;;  %s708_s2 = inlined_call_operand.vmem [shape: f32[1,128], index: 2, kind: input, shape index: {}]   ;;  %s709_s3 = inlined_call_operand.hbm [shape: f32[8,128], index: 3, kind: output, shape index: {}]  }
   0x1   :  { %9 = vsyncpa [#allocation6], 0 }
   0x2   :  { %10 = vsyncpa [#allocation4], 0  ;;  %s595_s12 = smov [#allocation2]   ;;  %s596_s14 = smov [#allocation5]  }
   0x3   :  { %s17_s13 = sshll.u32 %s595_s12, 4  ;;  %s26_s15 = sshll.u32 %s596_s14, 4  ;;  %s18_s13 = int_to_ptr.vmem [resolvable:$true] %s17_s13  ;;  %s628_s15 = int_to_ptr.vmem [resolvable:$true] %s26_s15 }
   0x4   :  { %s523_s18 = scalar_lea.hbm %s706_s0, 128 }
   0x5   :  { %p524_p0 = scmp.ne.s32.totalorder %s706_s0, %s523_s18  ;;  %p527_p1 = scmp.lt.u32.totalorder %s523_s18, %s706_s0 }
   0x7   :  { %p529_p2 = pnand %p527_p1, %p524_p0 }
   0x9   :  { %532 = shalt.err (!%p529_p2)
}
   0xa   :  { %s533_s23 = scalar_lea.vmem %s18_s13, 128  ;;  %p538_p4 = scmp.lt.s32.totalorder %s18_s13, %s18_s13 }
   0xb   :  { %p534_p3 = scmp.ne.s32.totalorder %s18_s13, %s533_s23  ;;  %p539_p5 = scmp.lt.s32.totalorder %s533_s23, %s533_s23 }
   0xd   :  { %p540_p6 = por %p539_p5, %p538_p4 }
   0xf   :  { %p541_p7 = pnand %p540_p6, %p534_p3 }
  0x11   :  { %544 = shalt.err (!%p541_p7)
}
  0x12   :  { %20 = dma.hbm_to_vmem [thread:$0]  %s706_s0, 128, %s18_s13, [#allocation3]  }
  0x13   :  { %s545_s28 = scalar_lea.hbm %s707_s1, 512 }
  0x14   :  { %p546_p8 = scmp.ne.s32.totalorder %s707_s1, %s545_s28  ;;  %p549_p9 = scmp.lt.u32.totalorder %s545_s28, %s707_s1 }
  0x16   :  { %p551_p10 = pnand %p549_p9, %p546_p8 }
  0x18   :  { %554 = shalt.err (!%p551_p10)
}
  0x19   :  { %s555_s6 = scalar_lea.vmem %s628_s15, 512  ;;  %p560_p12 = scmp.lt.s32.totalorder %s628_s15, %s628_s15 }
  0x1a   :  { %p556_p11 = scmp.ne.s32.totalorder %s628_s15, %s555_s6  ;;  %p561_p13 = scmp.lt.s32.totalorder %s555_s6, %s555_s6 }
  0x1c   :  { %p562_p0 = por %p561_p13, %p560_p12 }
  0x1e   :  { %p563_p1 = pnand %p562_p0, %p556_p11 }
  0x20   :  { %566 = shalt.err (!%p563_p1)
}
  0x21   :  { %s597_s0 = smov 128   ;;  %s598_s7 = smov 8  }
  0x22   :  { %32 = dma.hbm_to_vmem [thread:$0]  %s707_s1, 512, %s628_s15, [#allocation6], %s597_s0, %s597_s0, %s598_s7  }
  0x23   :  { %589 = dma.done.wait [#allocation3], 128  }
  0x24   :  { %590 = vsyncadd [#allocation3], 4294967168 }
  0x25   :  { %591 = dma.done.wait [#allocation6], 512  }
  0x26   :  { %592 = vsyncadd [#allocation6], 4294966784  ;;  %v599_v0 = vmov 64   ;;  %v600_v1 = vmov 0.0|0.0   ;;  %v661_v2 = vld [vmem:[#allocation2] sm:$0xff]  ;;  %v42_v3 = vld [vmem:[#allocation5] sm:$0xff] }
  0x27   :  { %492 = vset.pattern.permute.xlu0 %v599_v0  ;;  %459 = vmatprep.subr.bf16.mxu0 %v600_v1  ;;  %v43_v4 = vld [vmem:[#allocation5 + $0x8] sm:$0xff]  ;;  %vm57_vm0 = vcmp.gt.f32.partialorder %v661_v2, 0.5  ;;  %v44_v6 = vld [vmem:[#allocation5 + $0x10] sm:$0xff]  ;;  %v45_v7 = vld [vmem:[#allocation5 + $0x18] sm:$0xff]  ;;  %v601_v8 = vmov 0   ;;  %vm602_vm1 = vmmov 0  }
  0x28   :  { %465 = vmatprep.subr.bf16.mxu1 %v600_v1  ;;  %v460_v5 = vpack.c.bf16 %v43_v4, %v42_v3  ;;  %v58_v9 = vsel %vm57_vm0, 1, %v601_v8  ;;  %v463_v10 = vpack.c.bf16 %v45_v7, %v44_v6  ;;  %v603_v11 = vmov 0.0   ;;  %s604_s1 = smov 96   ;;  %v406_v14 = vld [vmem:[%s708_s2] ss:$0 sm:$0xff]  ;;  %s605_s2 = smov 64  }
  0x29   :  { %60 = vperm.xlu0 %492, %v58_v9   ;;  %434 = vmatprep.mubr.msk.f32.mxu0 %vm602_vm1, %v603_v11  ;;  %v493_v12 = vpack.i.bf16 %v43_v4, %v42_v3  ;;  %v498_v13 = vpack.i.bf16 %v45_v7, %v44_v6  ;;  %vm47_vm2 = vcmask 261120   ;;  %s606_s12 = smov 32   ;;  %vm377_vm4 = vcmask 523520   ;;  %s607_s16 = smov [#allocation7]  }
  0x2a   :  { %461 = vmatpush3.bf16.msra.mxu0 %v460_v5  ;;  %445 = vmatprep.mubr.msk.f32.mxu1 %vm602_vm1, %v603_v11  ;;  %v48_v15 = vsel %vm47_vm2, %v661_v2, 0.0  ;;  %v334_v9 = vmul.f32 %v661_v2, %v661_v2  ;;  %vm383_vm5 = vcmask 785920   ;;  %s396_s17 = sshll.u32 %s607_s16, 4  ;;  %vm385_vm6 = vcmask 794368   ;;  %s397_s17 = int_to_ptr.vmem [resolvable:$true] %s396_s17 }
  0x2b   :  { %462 = vmatprep.subr.bf16.mxu0 %v600_v1  ;;  %499 = vrot.lane.b32.xlu1 %v498_v13, %s604_s1  ;;  %v49_v16 = vrot.slane %v48_v15, 4  ;;  %vm388_vm7 = vcmask 802568   ;;  %s567_s18 = scalar_lea.vmem %s397_s17, 128  ;;  %p572_p3 = scmp.lt.s32.totalorder %s397_s17, %s397_s17 }
  0x2c   :  { %p568_p2 = scmp.ne.s32.totalorder %s397_s17, %s567_s18  ;;  %p573_p4 = scmp.lt.s32.totalorder %s567_s18, %s567_s18 }
  0x2d   :  { %494 = vrot.lane.b32.xlu0 %v493_v12, %s604_s1  ;;  %v50_v17 = vadd.f32 %v49_v16, %v48_v15 }
  0x2e   :  { %464 = vmatpush3.bf16.msra.mxu0 %v463_v10  ;;  %p574_p5 = por %p573_p4, %p572_p3 }
  0x2f   :  { %471 = vmatprep.subr.bf16.mxu0 %v600_v1  ;;  %160 = vrot.lane.b32.xlu1 %v406_v14, %s604_s1  ;;  %v51_v18 = vrot.slane %v50_v17, 2 }
  0x30   :  { %p575_p6 = pnand %p574_p5, %p568_p2 }
  0x31   :  { %v52_v19 = vadd.f32 %v51_v18, %v50_v17  ;;  %504 = vrot.lane.b32.xlu0 %v493_v12, %s605_s2  ;;  %v335_v12 = vmul.f32 -0.5, %v334_v9 }
  0x33   :  { %v53_v20 = vrot.slane %v52_v19, 1  ;;  %509 = vrot.lane.b32.xlu1 %v498_v13, %s605_s2 }
  0x35   :  { %v54_v21 = vadd.f32 %v53_v20, %v52_v19  ;;  %249 = vrot.lane.b32.xlu0 %v406_v14, %s605_s2 }
  0x37   :  { %v56_v22 = vmul.f32 0.125, %v54_v21 }
  0x9d   :  { %v500_v28 = vpop.permute.xlu1 %499 }
  0x9e   :  { %v502_v29 = vunpack.i.h.bf16 %v500_v28  ;;  %v501_v30 = vunpack.i.l.bf16 %v500_v28 }
  0xa0   :  { %v469_v32 = vpack.c.bf16 %v502_v29, %v501_v30 }
  0xa1   :  { %v161_v37 = vpop.permute.xlu1 %160 }
  0xa5   :  { %v510_v41 = vpop.permute.xlu1 %509 }
  0xa6   :  { %v512_v42 = vunpack.i.h.bf16 %v510_v41  ;;  %v511_v43 = vunpack.i.l.bf16 %v510_v41 }
  0xa8   :  { %v61_v23 = vpop.permute.xlu0 %60  ;;  %v475_v45 = vpack.c.bf16 %v512_v42, %v511_v43 }
  0xa9   :  { %vm62_vm3 = vcmp.eq.s32.totalorder %v61_v23, 1 }
  0xaa   :  { %v63_v24 = vsel %vm62_vm3, %v56_v22, 0.1 }
  0xab   :  { %435 = vmatmul.mubr.msk.f32.vlgmr.msra.gmra.mrb[0].mxu0 %vm47_vm2, %v63_v24 }
  0xac   :  { %456 = vmatprep.mubr.msk.f32.mxu0 %vm602_vm1, %v603_v11  ;;  %v495_v25 = vpop.permute.xlu0 %494 }
  0xad   :  { %v497_v26 = vunpack.i.h.bf16 %v495_v25  ;;  %v496_v27 = vunpack.i.l.bf16 %v495_v25 }
  0xaf   :  { %v466_v31 = vpack.c.bf16 %v497_v26, %v496_v27 }
  0xb0   :  { %v505_v38 = vpop.permute.xlu0 %504 }
  0xb1   :  { %467 = vmatpush3.bf16.msra.mxu1 %v466_v31  ;;  %v507_v39 = vunpack.i.h.bf16 %v505_v38  ;;  %v506_v40 = vunpack.i.l.bf16 %v505_v38 }
  0xb2   :  { %468 = vmatprep.subr.bf16.mxu1 %v600_v1 }
  0xb3   :  { %v472_v44 = vpack.c.bf16 %v507_v39, %v506_v40 }
  0xb4   :  { %v250_v50 = vpop.permute.xlu0 %249 }
  0xb5   :  { %470 = vmatpush3.bf16.msra.mxu1 %v469_v32  ;;  %473 = vmatpush3.bf16.msra.mxu0 %v472_v44 }
  0xb6   :  { %474 = vmatprep.subr.bf16.mxu0 %v600_v1 }
  0xb9   :  { %476 = vmatpush3.bf16.msra.mxu0 %v475_v45 }
 0x17e   :  { %v139_v33 = vpop.f32.mrb[0].mxu0 }
 0x17f   :  { %v140_v34 = vadd.f32 %v406_v14, %v139_v33  ;;  %v436_v35 = vpop.f32.mrb[1].mxu0 }
 0x181   :  { %513 = vtanh.f32 %v140_v34 }
 0x18b   :  { %v514_v36 = vpop.eup %513 }
 0x18c   :  { %446 = vmatmul.mubr.msk.f32.vlgmr.msra.gmra.mrb[0].mxu1 %vm47_vm2, %v514_v36 }
 0x25f   :  { %v232_v46 = vpop.f32.mrb[0].mxu1 }
 0x260   :  { %v233_v47 = vadd.f32 %v232_v46, %v161_v37  ;;  %v447_v48 = vpop.f32.mrb[1].mxu1 }
 0x262   :  { %515 = vtanh.f32 %v233_v47 }
 0x26c   :  { %v516_v49 = vpop.eup %515 }
 0x26d   :  { %457 = vmatmul.mubr.msk.f32.vlgmr.msra.gmra.mrb[2].mxu0 %vm47_vm2, %v516_v49 }
 0x340   :  { %v321_v51 = vpop.f32.mrb[2].mxu0 }
 0x341   :  { %v322_v52 = vadd.f32 %v321_v51, %v250_v50  ;;  %v458_v53 = vpop.f32.mrb[3].mxu0 }
 0x343   :  { %v325_v54 = vmul.f32 1.442695, %v322_v52  ;;  %356 = vrot.lane.b32.xlu0 %v322_v52, %s604_s1  ;;  %v336_v14 = vsub.f32 %v335_v12, %v322_v52 }
 0x345   :  { %517 = vpow2.f32 %v325_v54  ;;  %v410_v15 = vadd.f32 -0.9189385, %v336_v14 }
 0x34f   :  { %v518_v55 = vpop.eup %517 }
 0x350   :  { %v327_v56 = vmul.f32 %v518_v55, %v661_v2 }
 0x352   :  { %329 = vrot.lane.b32.xlu1 %v327_v56, %s604_s1 }
 0x3b5   :  { %v357_v57 = vpop.permute.xlu0 %356 }
 0x3b6   :  { %v359_v58 = vsel %vm47_vm2, %v357_v57, 0.0 }
 0x3b7   :  { %360 = vadd.xlane.f32.xlu0 %v359_v58 }
 0x3c4   :  { %v330_v59 = vpop.permute.xlu1 %329 }
 0x3c5   :  { %v332_v60 = vadd.f32 %v330_v59, %v322_v52 }
 0x3c7   :  { %519 = vtanh.f32 %v332_v60 }
 0x3cd   :  { %374 = vrot.lane.b32.xlu0 %v322_v52, %s606_s12 }
 0x3d1   :  { %v520_v61 = vpop.eup %519 }
 0x3d2   :  { %373 = vst.msk [vmem:[#allocation7] sm:$0xff] %vm47_vm2, %v520_v61  ;;  %v338_v62 = vmul.f32 %v520_v61, %v520_v61 }
 0x3d4   :  { %v339_v63 = vsub.f32 1.0, %v338_v62 }
 0x3d6   :  { %v340_v0 = vadd.f32 1e-06, %v339_v63 }
 0x3d8   :  { %521 = vlog2.f32 %v340_v0 }
 0x3e2   :  { %v522_v1 = vpop.eup %521 }
 0x3e3   :  { %v342_v3 = vmul.f32 0.6931472, %v522_v1 }
 0x3e5   :  { %344 = vrot.lane.b32.xlu1 %v342_v3, %s606_s12 }
 0x444   :  { %v361_v4 = vpop.xlane.xlu0 %360 }
 0x445   :  { %v362_v5 = vrot.slane %v361_v4, 4 }
 0x447   :  { %v363_v6 = vadd.f32 %v362_v5, %v361_v4 }
 0x448   :  { %v375_v7 = vpop.permute.xlu0 %374 }
 0x449   :  { %v364_v8 = vrot.slane %v363_v6, 2  ;;  %378 = vst.msk [vmem:[#allocation7] sm:$0xff] %vm377_vm4, %v375_v7 }
 0x44b   :  { %v365_v10 = vadd.f32 %v364_v8, %v363_v6 }
 0x44d   :  { %v366_v11 = vrot.slane %v365_v10, 1 }
 0x44f   :  { %v367_v13 = vadd.f32 %v366_v11, %v365_v10 }
 0x451   :  { %477 = vpush %v367_v13 }
 0x457   :  { %v345_v16 = vpop.permute.xlu1 %344 }
 0x458   :  { %v347_v17 = vsub.f32 %v410_v15, %v345_v16 }
 0x45a   :  { %349 = vrot.lane.b32.xlu1 %v347_v17, %s604_s1 }
 0x482   :  { %s478_s13 = spop %477 }
 0x483   :  { %s371_s14 = smul.f32 0.00390625, %s478_s13 }
 0x485   :  { %s372_s15 = sadd.f32 1.4189385, %s371_s14 }
 0x487   :  { %v387_v21 = vstv %s372_s15 }
 0x4cc   :  { %v350_v18 = vpop.permute.xlu1 %349 }
 0x4cd   :  { %v352_v19 = vsel %vm47_vm2, %v350_v18, 0.0 }
 0x4ce   :  { %353 = vadd.xlane.f32.xlu1 %v352_v19 }
 0x4df   :  { %380 = vrot.lane.b32.xlu1 %v518_v55, %s606_s12 }
 0x55b   :  { %v354_v2 = vpop.xlane.xlu1 %353 }
 0x55f   :  { %v381_v20 = vpop.permute.xlu1 %380 }
 0x560   :  { %384 = vst.msk [vmem:[#allocation7] sm:$0xff] %vm383_vm5, %v381_v20 }
 0x561   :  { %386 = vst.msk [vmem:[#allocation7] sm:$0xff] %vm385_vm6, %v354_v2 }
 0x562   :  { %389 = vst.msk [vmem:[#allocation7] sm:$0xff] %vm388_vm7, %v387_v21 }
 0x563   :  { %578 = shalt.err (!%p575_p6)
}
 0x564   :  { %s579_s21 = scalar_lea.hbm %s709_s3, 128 }
 0x565   :  { %p580_p7 = scmp.ne.s32.totalorder %s709_s3, %s579_s21  ;;  %p583_p8 = scmp.lt.u32.totalorder %s579_s21, %s709_s3 }
 0x567   :  { %p585_p9 = pnand %p583_p8, %p580_p7 }
 0x569   :  { %588 = shalt.err (!%p585_p9)
}
 0x56a   :  { %399 = dma.vmem_to_hbm [thread:$0]  %s397_s17, 128, %s709_s3, [#allocation4]  }
 0x56b   :  { %593 = dma.done.wait [#allocation4], 128  }
 0x56c   :  { %594 = vsyncadd [#allocation4], 4294967168 }
 0x56d   :  { %403 = vsyncpa [#allocation3], 1 }
 0x56e   :  { %404 = vsyncpa [#allocation6], 1 }
 0x56f   :  { %405 = vsyncpa [#allocation4], 1 }

</bundles_post_ra>
